<compile_context>
chip_gen: v6e
topology: v6e:2x2x1
jax: 0.10.0
libtpu: 0.0.40
codegen_flags: <defaults>
</compile_context>

<pallas_src>
import jax
import jax.numpy as jnp
from jax.experimental import pallas as pl
from jax.experimental.pallas import tpu as pltpu


def _ensemble_kernel(x_ref, wa_ref, ba_ref, wb_ref, bb_ref, o_ref):
    # x_ref : (BM, D)        bf16      wa_ref: (D, heads*HID)          bf16
    # ba_ref: (1, heads*HID) f32       wb_ref: (heads*HID, heads*OUT)  bf16 (block-diagonal)
    # bb_ref: (1, heads*OUT) f32       o_ref : (BM, heads*OUT)         f32
    h = jnp.dot(x_ref[...], wa_ref[...], preferred_element_type=jnp.float32)
    h = jnp.maximum(h + ba_ref[...], 0.0)              # all modelA heads (linear + ReLU), fused
    h = h.astype(wb_ref.dtype)                          # bf16 into the second MXU pass
    o = jnp.dot(h, wb_ref[...], preferred_element_type=jnp.float32)
    o_ref[...] = jnp.maximum(o + bb_ref[...], 0.0)      # modelB (linear + ReLU); concat via layout


def ensemble_forward(x_nchw, wa, ba, wb, bb):
    """x_nchw: [B, C, H, W] f32. wa: [heads, D, HID], ba: [heads, HID],
    wb: [HID, OUT], bb: [OUT].  Returns [B, heads * OUT] f32."""
    B = x_nchw.shape[0]
    D = x_nchw.shape[1] * x_nchw.shape[2] * x_nchw.shape[3]
    num_heads, _, HID = wa.shape
    OUT = wb.shape[1]
    NH, NO = num_heads * HID, num_heads * OUT

    # ---- layout / fusion prep (glue; done once in the wrapper) ----------------------------
    x2d = x_nchw.reshape(B, D).astype(jnp.bfloat16)
    # [heads, D, HID] -> [D, heads*HID] so column block h is head h's weights.
    wa_fused = jnp.transpose(wa, (1, 0, 2)).reshape(D, NH).astype(jnp.bfloat16)
    ba_fused = ba.reshape(1, NH).astype(jnp.float32)
    # Block-diagonal Wb: output column block h only sees hidden block h (= per-head modelB).
    wb_bd = jnp.kron(jnp.eye(num_heads, dtype=wb.dtype), wb).astype(jnp.bfloat16)
    bb_fused = jnp.tile(bb, num_heads).reshape(1, NO).astype(jnp.float32)

    # ---- grid: split batch rows into 2 parallel blocks when possible (v7x: one per TC) ----
    if B % 2 == 0 and (B // 2) % 16 == 0:   # 16-row granularity keeps bf16 sublane tiling clean
        bm = B // 2
    else:
        bm = B
    grid = (B // bm,)

    # Advisory cost estimate so XLA can schedule around this small custom call.
    flops = 2 * B * D * NH + 2 * B * NH * NO
    bytes_accessed = (x2d.size * 2 + wa_fused.size * 2 + wb_bd.size * 2
                      + ba_fused.size * 4 + bb_fused.size * 4 + B * NO * 4)
    cost = pl.CostEstimate(flops=flops, transcendentals=0, bytes_accessed=bytes_accessed)

    out = pl.pallas_call(
        _ensemble_kernel,
        out_shape=jax.ShapeDtypeStruct((B, NO), jnp.float32),
        grid_spec=pl.GridSpec(
            grid=grid,
            in_specs=[
                pl.BlockSpec((bm, D), lambda m: (m, 0)),    # x row block
                pl.BlockSpec((D, NH), lambda m: (0, 0)),    # fused Wa   (resident across steps)
                pl.BlockSpec((1, NH), lambda m: (0, 0)),    # fused ba
                pl.BlockSpec((NH, NO), lambda m: (0, 0)),   # block-diag Wb
                pl.BlockSpec((1, NO), lambda m: (0, 0)),    # tiled bb
            ],
            out_specs=pl.BlockSpec((bm, NO), lambda m: (m, 0)),  # lane-dense output slab
        ),
        compiler_params=pltpu.CompilerParams(
            dimension_semantics=("parallel",)),
        cost_estimate=cost,
    )(x2d, wa_fused, ba_fused, wb_bd, bb_fused)
    return out


def ensemble_reference(x_nchw, wa, ba, wb, bb):
    """Pure-JAX f32 reference mirroring the PyTorch forward semantics."""
    B = x_nchw.shape[0]
    x2d = x_nchw.reshape(B, -1)
    outs_a = [jnp.maximum(x2d @ wa[h] + ba[h], 0.0) for h in range(wa.shape[0])]
    outs_b = [jnp.maximum(o @ wb + bb, 0.0) for o in outs_a]
    return jnp.concatenate(outs_b, axis=1)


if __name__ == "__main__":
    # Shapes consistent with the module's forward; B raised to 128 per the perf review so the
    # matmul M dimension actually fills MXU rows (still small: ~0.5 MiB of input).
    B, C, H, W = 128, 4, 16, 16
    D = C * H * W               # 1024
    HID = 128                   # modelA head width
    OUT = 128                   # modelB output width
    NUM_HEADS = 2               # modelA returns 2 outputs

    key = jax.random.PRNGKey(0)
    kx, kwa, kba, kwb, kbb = jax.random.split(key, 5)

    x = jax.random.normal(kx, (B, C, H, W), dtype=jnp.float32)
    wa = jax.random.normal(kwa, (NUM_HEADS, D, HID), dtype=jnp.float32) * 0.02
    ba = jax.random.normal(kba, (NUM_HEADS, HID), dtype=jnp.float32) * 0.02
    wb = jax.random.normal(kwb, (HID, OUT), dtype=jnp.float32) * 0.02
    bb = jax.random.normal(kbb, (OUT,), dtype=jnp.float32) * 0.02

    out = jax.block_until_ready(ensemble_forward(x, wa, ba, wb, bb))
    ref = ensemble_reference(x, wa, ba, wb, bb)

    assert out.shape == (B, NUM_HEADS * OUT), out.shape
    # Kernel feeds bf16 operands to the MXU (f32 accumulate) -> compare at bf16 tolerance.
    assert jnp.allclose(out, ref, atol=3e-2, rtol=3e-2), \
        float(jnp.max(jnp.abs(out - ref)))

    print("KERNEL_OK")
</pallas_src>

<mosaic_0001>
module attributes {stable_mosaic.version = 11 : i64} {
  func.func @_ensemble_kernel(%arg0: i32, %arg1: memref<64x1024xbf16, #tpu.memory_space<vmem>>, %arg2: memref<1024x256xbf16, #tpu.memory_space<vmem>>, %arg3: memref<1x256xf32, #tpu.memory_space<vmem>>, %arg4: memref<256x256xbf16, #tpu.memory_space<vmem>>, %arg5: memref<1x256xf32, #tpu.memory_space<vmem>>, %arg6: memref<64x256xf32, #tpu.memory_space<vmem>>) attributes {dimension_semantics = [#tpu.dimension_semantics<parallel>], iteration_bounds = array<i64: 2>, scalar_prefetch = 0 : i64, scratch_operands = 0 : i64, tpu.core_type = #tpu.core_type<tc>, window_params = [{transform_indices = @transform_0, window_bounds = array<i64: 64, 1024>}, {pipeline_mode = #tpu.pipeline_mode<synchronous>, transform_indices = @transform_1, window_bounds = array<i64: 1024, 256>}, {pipeline_mode = #tpu.pipeline_mode<synchronous>, transform_indices = @transform_2, window_bounds = array<i64: 1, 256>}, {pipeline_mode = #tpu.pipeline_mode<synchronous>, transform_indices = @transform_3, window_bounds = array<i64: 256, 256>}, {pipeline_mode = #tpu.pipeline_mode<synchronous>, transform_indices = @transform_4, window_bounds = array<i64: 1, 256>}, {transform_indices = @transform_5, window_bounds = array<i64: 64, 256>}]} {
    %c0 = arith.constant 0 : index
    %c0_0 = arith.constant 0 : index
    %0 = vector.load %arg1[%c0, %c0_0] : memref<64x1024xbf16, #tpu.memory_space<vmem>>, vector<64x1024xbf16>
    %c0_1 = arith.constant 0 : index
    %c0_2 = arith.constant 0 : index
    %1 = vector.load %arg2[%c0_1, %c0_2] : memref<1024x256xbf16, #tpu.memory_space<vmem>>, vector<1024x256xbf16>
    %cst = arith.constant dense<0.000000e+00> : vector<64x256xf32>
    %2 = tpu.matmul %0, %1, %cst {dimension_numbers = #tpu.dot_dimension_numbers<[1], [0], [0], [1], [0, 0, 1, 1], [], []>} : vector<64x1024xbf16>, vector<1024x256xbf16>, vector<64x256xf32> -> vector<64x256xf32>
    %c0_3 = arith.constant 0 : index
    %c0_4 = arith.constant 0 : index
    %3 = vector.load %arg3[%c0_3, %c0_4] : memref<1x256xf32, #tpu.memory_space<vmem>>, vector<1x256xf32>
    %4 = vector.broadcast %3 : vector<1x256xf32> to vector<64x256xf32>
    %5 = arith.addf %2, %4 : vector<64x256xf32>
    %cst_5 = arith.constant 0.000000e+00 : f32
    %6 = vector.broadcast %cst_5 : f32 to vector<64x256xf32>
    %7 = arith.maximumf %5, %6 : vector<64x256xf32>
    %8 = arith.truncf %7 : vector<64x256xf32> to vector<64x256xbf16>
    %c0_6 = arith.constant 0 : index
    %c0_7 = arith.constant 0 : index
    %9 = vector.load %arg4[%c0_6, %c0_7] : memref<256x256xbf16, #tpu.memory_space<vmem>>, vector<256x256xbf16>
    %cst_8 = arith.constant dense<0.000000e+00> : vector<64x256xf32>
    %10 = tpu.matmul %8, %9, %cst_8 {dimension_numbers = #tpu.dot_dimension_numbers<[1], [0], [0], [1], [0, 0, 1, 1], [], []>} : vector<64x256xbf16>, vector<256x256xbf16>, vector<64x256xf32> -> vector<64x256xf32>
    %c0_9 = arith.constant 0 : index
    %c0_10 = arith.constant 0 : index
    %11 = vector.load %arg5[%c0_9, %c0_10] : memref<1x256xf32, #tpu.memory_space<vmem>>, vector<1x256xf32>
    %12 = vector.broadcast %11 : vector<1x256xf32> to vector<64x256xf32>
    %13 = arith.addf %10, %12 : vector<64x256xf32>
    %cst_11 = arith.constant 0.000000e+00 : f32
    %14 = vector.broadcast %cst_11 : f32 to vector<64x256xf32>
    %15 = arith.maximumf %13, %14 : vector<64x256xf32>
    %c0_12 = arith.constant 0 : index
    %c0_13 = arith.constant 0 : index
    %16 = vector.load %arg6[%c0_12, %c0_13] : memref<64x256xf32, #tpu.memory_space<vmem>>, vector<64x256xf32>
    tpu.vector_store %arg6[%c0_12, %c0_13], %15 {strides = array<i32>} : memref<64x256xf32, #tpu.memory_space<vmem>>, vector<64x256xf32>,
    return
  }
  func.func @transform_0(%arg0: i32) -> (i32, i32) {
    %c0_i32 = arith.constant 0 : i32
    %c0_i32_0 = arith.constant 0 : i32
    return %arg0, %c0_i32 : i32, i32
  }
  func.func @transform_1(%arg0: i32) -> (i32, i32) {
    %c0_i32 = arith.constant 0 : i32
    %c0_i32_0 = arith.constant 0 : i32
    %c0_i32_1 = arith.constant 0 : i32
    return %c0_i32, %c0_i32_0 : i32, i32
  }
  func.func @transform_2(%arg0: i32) -> (i32, i32) {
    %c0_i32 = arith.constant 0 : i32
    %c0_i32_0 = arith.constant 0 : i32
    %c0_i32_1 = arith.constant 0 : i32
    return %c0_i32, %c0_i32_0 : i32, i32
  }
  func.func @transform_3(%arg0: i32) -> (i32, i32) {
    %c0_i32 = arith.constant 0 : i32
    %c0_i32_0 = arith.constant 0 : i32
    %c0_i32_1 = arith.constant 0 : i32
    return %c0_i32, %c0_i32_0 : i32, i32
  }
  func.func @transform_4(%arg0: i32) -> (i32, i32) {
    %c0_i32 = arith.constant 0 : i32
    %c0_i32_0 = arith.constant 0 : i32
    %c0_i32_1 = arith.constant 0 : i32
    return %c0_i32, %c0_i32_0 : i32, i32
  }
  func.func @transform_5(%arg0: i32) -> (i32, i32) {
    %c0_i32 = arith.constant 0 : i32
    %c0_i32_0 = arith.constant 0 : i32
    return %arg0, %c0_i32 : i32, i32
  }
}

</mosaic_0001>

<bundles_post_ra>
// kernel: tpu_custom_call.1
= control target key start
LH: loop header
LB: loop body
LE: loop exit
PB: predicated region body
PF: predicated region fallthrough
CT: control target
= control target key end

     0   :  { %10 = vsyncpa [#allocation3], 0  ;;  %s3087_s0 = inlined_call_operand.hbm [shape: bf16[128,1024], index: 0, kind: input, shape index: {}]   ;;  %s3088_s1 = inlined_call_operand.hbm [shape: bf16[1024,256], index: 1, kind: input, shape index: {}]   ;;  %s3089_s2 = inlined_call_operand.vmem [shape: f32[1,256], index: 2, kind: input, shape index: {}]   ;;  %s3090_s3 = inlined_call_operand.hbm [shape: bf16[256,256], index: 3, kind: input, shape index: {}]   ;;  %s3091_s4 = inlined_call_operand.vmem [shape: f32[1,256], index: 4, kind: input, shape index: {}]   ;;  %s3092_s5 = inlined_call_operand.hbm [shape: f32[128,256], index: 5, kind: output, shape index: {}]  }
   0x1   :  { %12 = vsyncpa [#allocation3 + $0x1], 0 }
   0x2   :  { %13 = vsyncpa [#allocation6], 0 }
   0x3   :  { %14 = vsyncpa [#allocation4], 0 }
   0x4   :  { %16 = vsyncpa [#allocation4 + $0x1], 0  ;;  %s2730_s18 = smov 0   ;;  %s2732_s19 = smov 0  }
   0x5   :  { %s2734_s20 = smov 0   ;;  %s2736_s21 = smov 0  }
   0x6 LB: > { %s2751_s22 = sadd.s32 4294967295, %s2688_s21   ;;  %s1979_s23 = sadd.s32 4294967294, %s2688_s21   ;;  %s2688_s21 = sphi %s2736_s21, %s3114_s21   ;;  %s2684_s20 = sphi %s2734_s20, %s3113_s20   ;;  %s2680_s19 = sphi %s2732_s19, %s3112_s19   ;;  %s2676_s18 = sphi %s2730_s18, %s3111_s18  }
   0x7   : > { %p42_p0 = scmp.ne.s32.totalorder %s2680_s19, %s2676_s18  ;;  %p3093_p1 = scmp.eq.s32.totalorder %s2751_s22, 0 }
   0x8   : > { %p156_p3 = scmp.eq.s32.totalorder %s1979_s23, 1  ;;  %p1980_p5 = scmp.ge.s32.totalorder %s2688_s21, 1 }
   0x9   : > { %p2760_p4 = por %p3093_p1, %p42_p0  ;;  %p163_p7 = scmp.lt.s32.totalorder %s2688_s21, 3 }
   0xa   : > { %p2765_p6 = por %p156_p3, %p42_p0  ;;  %s2690_s27 = smov [#allocation5]  }
   0xb   : > { %s3097_s24 = scalar_select %p2760_p4, 1, 0 }
   0xc   : > { %s3098_s25 = scalar_select %p2765_p6, 1, 0 }
   0xd   : > { %p2770_p8 = pnand %p1980_p5, %p163_p7  ;;  %s175_s28 = sshll.u32 %s2690_s27, 4  ;;  %s176_s28 = int_to_ptr.vmem [resolvable:$true] %s175_s28 }
   0xe   : > { %s2691_s30 = smov [#allocation7]   ;;  %s2551_s7 = scalar_lea.vmem %s176_s28, 16384 }
   0xf   : > { %s3099_s26 = scalar_select %p2770_p8, 1, 0 }
  0x10   : > { %p2239_p9 = pneg %p2770_p8  ;;  %s191_s6 = sshll.u32 %s2691_s30, 4  ;;  %s192_s6 = int_to_ptr.vmem [resolvable:$true] %s191_s6 }
  0x11   : > { %p2552_p13 = scmp.ne.s32.totalorder %s176_s28, %s2551_s7  ;;  %p2559_p5 = scmp.lt.s32.totalorder %s176_s28, %s176_s28 }
  0x12   : > { %p2779_p11 = pnand %p2239_p9, %p3093_p1  ;;  %p2560_p7 = scmp.lt.s32.totalorder %s2551_s7, %s2551_s7 }
  0x14   : > { %p2542_p12 = pneg %p2779_p11  ;;  %p2561_p10 = por %p2560_p7, %p2559_p5 }
  0x16   : > { %p2554_p0 = pnand %p2552_p13, %p2542_p12 }
  0x18   : > { %p2555_p3 = pneg %p2554_p0 }
  0x1a   : > { %p2562_p9 = pnand %p2561_p10, %p2555_p3 }
  0x1c   : > { %2565 = shalt.err (!%p2562_p9)
}
  0x1d   : > { %s2692_s8 = smov 128   ;;  %s2693_s9 = smov 8  }
  0x1e   : > { %2242 = dma.hbm_to_vmem [thread:$0]  (!%p2779_p11), %s3088_s1, 16384, %s176_s28, [#allocation6], %s2692_s8, %s2692_s8, %s2693_s9  }
  0x1f   : > { %s2577_s12 = scalar_lea.vmem %s192_s6, 4096  ;;  %p2585_p2 = scmp.lt.s32.totalorder %s192_s6, %s192_s6 }
  0x20   : > { %p2578_p1 = scmp.ne.s32.totalorder %s192_s6, %s2577_s12  ;;  %p2586_p6 = scmp.lt.s32.totalorder %s2577_s12, %s2577_s12 }
  0x22   : > { %p2580_p13 = pnand %p2578_p1, %p2542_p12  ;;  %p2587_p5 = por %p2586_p6, %p2585_p2 }
  0x24   : > { %p2581_p0 = pneg %p2580_p13 }
  0x26   : > { %p2588_p10 = pnand %p2587_p5, %p2581_p0 }
  0x28   : > { %2591 = shalt.err (!%p2588_p10)
}
  0x29   : > { %2245 = dma.hbm_to_vmem [thread:$0]  (!%p2779_p11), %s3090_s3, 4096, %s192_s6, [#allocation6], %s2692_s8, %s2692_s8, %s2693_s9  }
  0x2a   : > { %s2802_s15 = sadd.s32 1, %s2688_s21   ;;  %s29_s16 = sadd.s32 1, %s2684_s20 }
  0x2b   : > { %s26_s17 = ssub.s32 %s2688_s21, %s2802_s15  ;;  %p36_p1 = scmp.ne.s32.totalorder %s2684_s20, %s2680_s19 }
  0x2c   : > { %p27_p2 = scmp.eq.s32.totalorder %s26_s17, 0  ;;  %p37_p6 = scmp.eq.s32.totalorder %s2688_s21, 0 }
  0x2d   : > { %p3101_p12 = scmp.eq.s32.totalorder %s2751_s22, 1  ;;  %p2256_p7 = scmp.lt.s32.totalorder %s2688_s21, 2 }
  0x2e   : > { %s2818_s27 = scalar_select %p27_p2, %s2684_s20, %s29_s16  }
  0x2f   : > { %p2812_p3 = por %p3101_p12, %p36_p1  ;;  %p38_p9 = por %p37_p6, %p36_p1 }
  0x30   : > { %s208_s28 = sand.u32 1, %s2684_s20   ;;  %s2192_s30 = sshll.u32 %s2688_s21, 12 }
  0x31   : > { %s3102_s23 = scalar_select %p2812_p3, 1, 0 }
  0x32   : > { %s1984_s29 = sshll.u32 %s208_s28, 8  ;;  %s2825_s8 = scalar_lea.hbm %s3087_s0, %s2192_s30 }
  0x33   : > { %s212_s9 = scalar_lea.vmem [#allocation2], %s1984_s29  ;;  %p2829_p11 = pnand %p2256_p7, %p38_p9 }
  0x34   : > { %s220_s10 = sshll.u32 %s212_s9, 4  ;;  %s2833_s12 = scalar_lea.sflag [#allocation3], %s208_s28  ;;  %s2827_s10 = int_to_ptr.vmem [resolvable:$true] %s220_s10 }
  0x35   : > { %s2592_s13 = scalar_lea.hbm %s2825_s8, 4096  ;;  %p2594_p0 = pneg %p2829_p11 }
  0x36   : > { %p2593_p13 = scmp.ne.s32.totalorder %s2825_s8, %s2592_s13  ;;  %s2597_s17 = scalar_lea.hbm %s3087_s0, 8192 }
  0x37   : > { %p2598_p1 = scmp.lt.s32.totalorder %s2825_s8, %s3087_s0  ;;  %p2599_p2 = scmp.lt.s32.totalorder %s2597_s17, %s2592_s13 }
  0x38   : > { %p2595_p5 = pnand %p2594_p0, %p2593_p13 }
  0x39   : > { %p2600_p6 = por %p2599_p2, %p2598_p1 }
  0x3a   : > { %p2596_p10 = pneg %p2595_p5 }
  0x3c   : > { %p2601_p12 = pnand %p2600_p6, %p2596_p10 }
  0x3e   : > { %2604 = shalt.err (!%p2601_p12)
}
  0x3f   : > { %s2605_s28 = scalar_lea.vmem %s2827_s10, 4096  ;;  %s2694_s6 = smov [#allocation2]  }
  0x40   : > { %p2606_p7 = scmp.ne.s32.totalorder %s2827_s10, %s2605_s28  ;;  %s2610_s7 = sshll.u32 %s2694_s6, 4  ;;  %s2611_s7 = int_to_ptr.vmem [resolvable:$false] %s2610_s7 }
  0x41   : > { %s2612_s9 = scalar_lea.vmem %s2611_s7, 8192  ;;  %p2613_p5 = scmp.lt.s32.totalorder %s2827_s10, %s2611_s7 }
  0x42   : > { %p2608_p9 = pnand %p2606_p7, %p2594_p0  ;;  %p2614_p3 = scmp.lt.s32.totalorder %s2612_s9, %s2605_s28 }
  0x44   : > { %p2609_p13 = pneg %p2608_p9  ;;  %p2615_p4 = por %p2614_p3, %p2613_p5 }
  0x46   : > { %p2616_p8 = pnand %p2615_p4, %p2609_p13 }
  0x48   : > { %2619 = shalt.err (!%p2616_p8)
}
  0x49   : > { %s2695_s13 = smov 512   ;;  %s2696_s14 = smov 32  }
  0x4a   : > { %2249 = dma.hbm_to_vmem [thread:$0]  (!%p2829_p11), %s2825_s8, 4096, %s2827_s10, %s2833_s12, %s2695_s13, %s2695_s13, %s2696_s14  }
  0x4b   : > { %p3104_p0 = scmp.ne.s32.totalorder %s3099_s26, 0 }
  0x4c   : > { %s2857_s16 = sand.u32 (!%p3104_p0), 1, %s2680_s19   ;;  %p3105_p4 = scmp.ne.s32.totalorder (!%p3104_p0), %s3097_s24, 0 }
  0x4d   : > { %232 = sbr.rel (%p3104_p0) target bundleno = 664 (0x298), region = 40  ;;  %s1989_s17 = sshll.u32 (!%p3104_p0), %s2857_s16, 8 }
  0x4e   : > { %s235_s29 = scalar_lea.sflag (!%p3104_p0), [#allocation3], %s2857_s16  ;;  %s2861_s30 = scalar_lea.vmem (!%p3104_p0), [#allocation2], %s1989_s17 }
  0x52   : > { %2663 = dma.done.wait (%p3105_p4), %s235_s29, 4096  }
  0x53   : > { %2665 = vsyncadd (%p3105_p4), %s235_s29, 4294963200  ;;  %p3106_p8 = scmp.eq.s32.totalorder %s2751_s22, 0 }
  0x55   : > { %2667 = dma.done.wait (%p3106_p8), [#allocation6], 20480   ;;  %p3107_p3 = pmov %p3106_p8 }
  0x56   : > { %v2300_v0 = vld [vmem:[#allocation5 + $0x74] ss:$8 sps:$4 sm:$0xff]   ;;  %v2304_v2 = vld [vmem:[#allocation5 + $0x70] ss:$8 sps:$4 sm:$0xff]   ;;  %v2306_v4 = vld [vmem:[#allocation5 + $0x64] ss:$8 sps:$4 sm:$0xff]  }
  0x57   : > { %2669 = vsyncadd (%p3107_p3), [#allocation6], 4294946816  ;;  %v2302_v1 = vld [vmem:[#allocation5 + $0x174] ss:$8 sps:$4 sm:$0xff]   ;;  %1247 = vmatprep.subr.bf16.mxu0 %v2300_v0  ;;  %v2305_v3 = vld [vmem:[#allocation5 + $0x170] ss:$8 sps:$4 sm:$0xff]  }
  0x58   : > { %1320 = vmatprep.subr.bf16.mxu1 %v2302_v1  ;;  %1248 = vmatpush1.bf16.msra.mxu0 %v2304_v2  ;;  %v2308_v5 = vld [vmem:[#allocation5 + $0x164] ss:$8 sps:$4 sm:$0xff]   ;;  %v2310_v6 = vld [vmem:[#allocation5 + $0x60] ss:$8 sps:$4 sm:$0xff]   ;;  %v2312_v8 = vld [vmem:[#allocation5 + $0x54] ss:$8 sps:$4 sm:$0xff]  }
  0x59   : > { %1321 = vmatpush1.bf16.msra.mxu1 %v2305_v3  ;;  %1249 = vmatprep.subr.bf16.mxu0 %v2306_v4  ;;  %v2311_v7 = vld [vmem:[#allocation5 + $0x160] ss:$8 sps:$4 sm:$0xff]   ;;  %v2314_v9 = vld [vmem:[#allocation5 + $0x154] ss:$8 sps:$4 sm:$0xff]   ;;  %v2316_v10 = vld [vmem:[#allocation5 + $0x50] ss:$8 sps:$4 sm:$0xff]  }
  0x5a   : > { %1322 = vmatprep.subr.bf16.mxu1 %v2308_v5  ;;  %v2317_v11 = vld [vmem:[#allocation5 + $0x150] ss:$8 sps:$4 sm:$0xff]   ;;  %v2318_v12 = vld [vmem:[#allocation5 + $0x44] ss:$8 sps:$4 sm:$0xff]   ;;  %v2322_v14 = vld [vmem:[#allocation5 + $0x40] ss:$8 sps:$4 sm:$0xff]  }
  0x5b   : > { %v2320_v13 = vld [vmem:[#allocation5 + $0x144] ss:$8 sps:$4 sm:$0xff]   ;;  %v2323_v15 = vld [vmem:[#allocation5 + $0x140] ss:$8 sps:$4 sm:$0xff]   ;;  %v2324_v16 = vld [vmem:[#allocation5 + $0x34] ss:$8 sps:$4 sm:$0xff]  }
  0x5c   : > { %1250 = vmatpush1.bf16.msra.mxu0 %v2310_v6  ;;  %v2326_v17 = vld [vmem:[#allocation5 + $0x134] ss:$8 sps:$4 sm:$0xff]   ;;  %v2328_v18 = vld [vmem:[#allocation5 + $0x30] ss:$8 sps:$4 sm:$0xff]   ;;  %v2330_v20 = vld [vmem:[#allocation5 + $0x24] ss:$8 sps:$4 sm:$0xff]  }
  0x5d   : > { %1323 = vmatpush1.bf16.msra.mxu1 %v2311_v7  ;;  %1251 = vmatprep.subr.bf16.mxu0 %v2312_v8  ;;  %v2329_v19 = vld [vmem:[#allocation5 + $0x130] ss:$8 sps:$4 sm:$0xff]   ;;  %v2332_v21 = vld [vmem:[#allocation5 + $0x124] ss:$8 sps:$4 sm:$0xff]   ;;  %v2334_v22 = vld [vmem:[#allocation5 + $0x20] ss:$8 sps:$4 sm:$0xff]  }
  0x5e   : > { %1324 = vmatprep.subr.bf16.mxu1 %v2314_v9  ;;  %v2335_v23 = vld [vmem:[#allocation5 + $0x120] ss:$8 sps:$4 sm:$0xff]   ;;  %v2336_v24 = vld [vmem:[#allocation5 + $0x14] ss:$8 sps:$4 sm:$0xff]   ;;  %v2340_v26 = vld [vmem:[#allocation5 + $0x10] ss:$8 sps:$4 sm:$0xff]  }
  0x5f   : > { %v2338_v25 = vld [vmem:[#allocation5 + $0x114] ss:$8 sps:$4 sm:$0xff]   ;;  %v2341_v27 = vld [vmem:[#allocation5 + $0x110] ss:$8 sps:$4 sm:$0xff]   ;;  %v2342_v28 = vld [vmem:[#allocation5 + $0x4] ss:$8 sps:$4 sm:$0xff]  }
  0x60   : > { %1252 = vmatpush1.bf16.msra.mxu0 %v2316_v10  ;;  %v2344_v29 = vld [vmem:[#allocation5 + $0x104] ss:$8 sps:$4 sm:$0xff]   ;;  %v2346_v30 = vld [vmem:[#allocation5] ss:$8 sps:$4 sm:$0xff]   ;;  %v2348_v32 = vld [vmem:[#allocation5 + $0xf4] ss:$8 sps:$4 sm:$0xff]  }
  0x61   : > { %1325 = vmatpush1.bf16.msra.mxu1 %v2317_v11  ;;  %1253 = vmatprep.subr.bf16.mxu0 %v2318_v12  ;;  %v2347_v31 = vld [vmem:[#allocation5 + $0x100] ss:$8 sps:$4 sm:$0xff]   ;;  %v2350_v33 = vld [vmem:[#allocation5 + $0x1f4] ss:$8 sps:$4 sm:$0xff]   ;;  %v2352_v34 = vld [vmem:[#allocation5 + $0xf0] ss:$8 sps:$4 sm:$0xff]  }
  0x62   : > { %1326 = vmatprep.subr.bf16.mxu1 %v2320_v13  ;;  %v2353_v35 = vld [vmem:[#allocation5 + $0x1f0] ss:$8 sps:$4 sm:$0xff]   ;;  %v2354_v36 = vld [vmem:[#allocation5 + $0xe4] ss:$8 sps:$4 sm:$0xff]   ;;  %v2358_v38 = vld [vmem:[#allocation5 + $0xe0] ss:$8 sps:$4 sm:$0xff]  }
  0x63   : > { %v2356_v37 = vld [vmem:[#allocation5 + $0x1e4] ss:$8 sps:$4 sm:$0xff]   ;;  %v2359_v39 = vld [vmem:[#allocation5 + $0x1e0] ss:$8 sps:$4 sm:$0xff]   ;;  %v2360_v40 = vld [vmem:[#allocation5 + $0xd4] ss:$8 sps:$4 sm:$0xff]  }
  0x64   : > { %1254 = vmatpush1.bf16.msra.mxu0 %v2322_v14  ;;  %v2362_v41 = vld [vmem:[#allocation5 + $0x1d4] ss:$8 sps:$4 sm:$0xff]   ;;  %v2364_v42 = vld [vmem:[#allocation5 + $0xd0] ss:$8 sps:$4 sm:$0xff]   ;;  %v2366_v44 = vld [vmem:[#allocation5 + $0xc4] ss:$8 sps:$4 sm:$0xff]  }
  0x65   : > { %1327 = vmatpush1.bf16.msra.mxu1 %v2323_v15  ;;  %1255 = vmatprep.subr.bf16.mxu0 %v2324_v16  ;;  %v2365_v43 = vld [vmem:[#allocation5 + $0x1d0] ss:$8 sps:$4 sm:$0xff]   ;;  %v2368_v45 = vld [vmem:[#allocation5 + $0x1c4] ss:$8 sps:$4 sm:$0xff]   ;;  %v2370_v46 = vld [vmem:[#allocation5 + $0xc0] ss:$8 sps:$4 sm:$0xff]  }
  0x66   : > { %1328 = vmatprep.subr.bf16.mxu1 %v2326_v17  ;;  %v2371_v47 = vld [vmem:[#allocation5 + $0x1c0] ss:$8 sps:$4 sm:$0xff]   ;;  %v2372_v52 = vld [vmem:[#allocation5 + $0xb4] ss:$8 sps:$4 sm:$0xff]   ;;  %v2376_v56 = vld [vmem:[#allocation5 + $0xb0] ss:$8 sps:$4 sm:$0xff]  }
  0x67   : > { %v275_v48 = vld [vmem:[%s2861_s30] sm:$0xff]  ;;  %v276_v50 = vld [vmem:[%s2861_s30 + $0x8] sm:$0xff]  ;;  %v2374_v54 = vld [vmem:[#allocation5 + $0x1b4] ss:$8 sps:$4 sm:$0xff]   ;;  %s1992_s11 = sshll.u32 %s2857_s16, 7  ;;  %s2194_s28 = sshll.u32 %s2751_s22, 11 }
  0x68   : > { %1256 = vmatpush1.bf16.msra.mxu0 %v2328_v18  ;;  %v279_v49 = vld [vmem:[%s2861_s30 + $0x20] sm:$0xff]  ;;  %v280_v51 = vld [vmem:[%s2861_s30 + $0x28] sm:$0xff]  ;;  %v2377_v57 = vld [vmem:[#allocation5 + $0x1b0] ss:$8 sps:$4 sm:$0xff]   ;;  %s3012_s12 = scalar_lea.vmem [#allocation8], %s1992_s11  ;;  %s3040_s13 = scalar_lea.hbm %s3092_s5, %s2194_s28 }
  0x69   : > { %1329 = vmatpush1.bf16.msra.mxu1 %v2329_v19  ;;  %1257 = vmatprep.subr.bf16.mxu0 %v2330_v20  ;;  %v1994_v53 = vcombine.high %v275_v48, %v279_v49  ;;  %v1996_v55 = vcombine.high %v276_v50, %v280_v51  ;;  %v2378_v58 = vld [vmem:[#allocation5 + $0xa4] ss:$8 sps:$4 sm:$0xff]   ;;  %v2382_v60 = vld [vmem:[#allocation5 + $0xa0] ss:$8 sps:$4 sm:$0xff]   ;;  %v2384_v62 = vld [vmem:[#allocation5 + $0x94] ss:$8 sps:$4 sm:$0xff]   ;;  %v1993_v8 = vcombine.low %v275_v48, %v279_v49 }
  0x6a   : > { %1330 = vmatprep.subr.bf16.mxu1 %v2332_v21  ;;  %v2380_v59 = vld [vmem:[#allocation5 + $0x1a4] ss:$8 sps:$4 sm:$0xff]   ;;  %v2383_v61 = vld [vmem:[#allocation5 + $0x1a0] ss:$8 sps:$4 sm:$0xff]   ;;  %v2386_v63 = vld [vmem:[#allocation5 + $0x194] ss:$8 sps:$4 sm:$0xff]   ;;  %v1995_v9 = vcombine.low %v276_v50, %v280_v51 }
  0x6b   : > { %1279 = vmatprep.mubr.bf16.mxu0 %v1994_v53  ;;  %1352 = vmatprep.mubr.bf16.mxu1 %v1996_v55  ;;  %v2388_v0 = vld [vmem:[#allocation5 + $0x90] ss:$8 sps:$4 sm:$0xff]   ;;  %v2390_v2 = vld [vmem:[#allocation5 + $0x84] ss:$8 sps:$4 sm:$0xff]   ;;  %v2394_v4 = vld [vmem:[#allocation5 + $0x80] ss:$8 sps:$4 sm:$0xff]  }
  0x6c   : > { %1258 = vmatpush1.bf16.msra.mxu0 %v2334_v22  ;;  %v2389_v1 = vld [vmem:[#allocation5 + $0x190] ss:$8 sps:$4 sm:$0xff]   ;;  %v2392_v3 = vld [vmem:[#allocation5 + $0x184] ss:$8 sps:$4 sm:$0xff]   ;;  %v2395_v5 = vld [vmem:[#allocation5 + $0x180] ss:$8 sps:$4 sm:$0xff]  }
  0x6d   : > { %1331 = vmatpush1.bf16.msra.mxu1 %v2335_v23  ;;  %1259 = vmatprep.subr.bf16.mxu0 %v2336_v24  ;;  %v2398_v6 = vld [vmem:[#allocation5 + $0x274] ss:$8 sps:$4 sm:$0xff]   ;;  %v2396_v10 = vld [vmem:[#allocation5 + $0x270] ss:$8 sps:$4 sm:$0xff]   ;;  %v2404_v12 = vld [vmem:[#allocation5 + $0x264] ss:$8 sps:$4 sm:$0xff]  }
  0x6e   : > { %1332 = vmatprep.subr.bf16.mxu1 %v2338_v25  ;;  %v2401_v7 = vld [vmem:[#allocation5 + $0x374] ss:$8 sps:$4 sm:$0xff]   ;;  %v2399_v11 = vld [vmem:[#allocation5 + $0x370] ss:$8 sps:$4 sm:$0xff]   ;;  %v2407_v13 = vld [vmem:[#allocation5 + $0x364] ss:$8 sps:$4 sm:$0xff]  }
  0x6f   : > { %v2402_v14 = vld [vmem:[#allocation5 + $0x260] ss:$8 sps:$4 sm:$0xff]   ;;  %v2410_v16 = vld [vmem:[#allocation5 + $0x254] ss:$8 sps:$4 sm:$0xff]   ;;  %v2408_v24 = vld [vmem:[#allocation5 + $0x250] ss:$8 sps:$4 sm:$0xff]  }
  0x70   : > { %1260 = vmatpush1.bf16.msra.mxu0 %v2340_v26  ;;  %v2405_v15 = vld [vmem:[#allocation5 + $0x360] ss:$8 sps:$4 sm:$0xff]   ;;  %v2413_v17 = vld [vmem:[#allocation5 + $0x354] ss:$8 sps:$4 sm:$0xff]   ;;  %v2411_v25 = vld [vmem:[#allocation5 + $0x350] ss:$8 sps:$4 sm:$0xff]  }
  0x71   : > { %1333 = vmatpush1.bf16.msra.mxu1 %v2341_v27  ;;  %1261 = vmatprep.subr.bf16.mxu0 %v2342_v28  ;;  %v283_v18 = vld [vmem:[%s2861_s30 + $0x40] sm:$0xff]  ;;  %v284_v20 = vld [vmem:[%s2861_s30 + $0x48] sm:$0xff]  ;;  %v2437_v55 = vld [vmem:[#allocation5 + $0x314] ss:$8 sps:$4 sm:$0xff]   ;;  %s1887_s6 = sshll.u32 %s3012_s12, 4  ;;  %s1873_s22 = scalar_lea.sflag [#allocation4], %s2857_s16  ;;  %s3042_s6 = int_to_ptr.vmem [resolvable:$true] %s1887_s6 }
  0x72   : > { %1334 = vmatprep.subr.bf16.mxu1 %v2344_v29  ;;  %v287_v19 = vld [vmem:[%s2861_s30 + $0x60] sm:$0xff]  ;;  %v288_v22 = vld [vmem:[%s2861_s30 + $0x68] sm:$0xff]  ;;  %s2620_s14 = scalar_lea.vmem %s3042_s6, 2048  ;;  %p3108_p10 = scmp.ne.s32.totalorder %s3102_s23, 0 }
  0x73   : > { %v2002_v21 = vcombine.high %v283_v18, %v287_v19  ;;  %v2004_v23 = vcombine.high %v284_v20, %v288_v22  ;;  %v2001_v26 = vcombine.low %v283_v18, %v287_v19  ;;  %v2003_v27 = vcombine.low %v284_v20, %v288_v22  ;;  %v2416_v28 = vld [vmem:[#allocation5 + $0x244] ss:$8 sps:$4 sm:$0xff]   ;;  %v2426_v51 = vld [vmem:[#allocation5 + $0x220] ss:$8 sps:$4 sm:$0xff]   ;;  %v2470_v22 = vld [vmem:[#allocation5 + $0x2b4] ss:$8 sps:$4 sm:$0xff]   ;;  %p2621_p11 = scmp.ne.s32.totalorder %s3042_s6, %s2620_s14 }
  0x74   : > { %1262 = vmatpush1.bf16.msra.mxu0 %v2346_v30  ;;  %v2419_v29 = vld [vmem:[#allocation5 + $0x344] ss:$8 sps:$4 sm:$0xff]   ;;  %v2414_v30 = vld [vmem:[#allocation5 + $0x240] ss:$8 sps:$4 sm:$0xff]   ;;  %s2697_s17 = smov [#allocation8]  }
  0x75   : > { %1335 = vmatpush1.bf16.msra.mxu1 %v2347_v31  ;;  %1263 = vmatprep.subr.bf16.mxu0 %v2348_v32  ;;  %v2417_v31 = vld [vmem:[#allocation5 + $0x340] ss:$8 sps:$4 sm:$0xff]   ;;  %v2464_v18 = vld [vmem:[#allocation5 + $0x2c4] ss:$8 sps:$4 sm:$0xff]   ;;  %p2622_p1 = pnand %p2621_p11, %p3108_p10  ;;  %s2624_s29 = sshll.u32 %s2697_s17, 4  ;;  %s2625_s29 = int_to_ptr.vmem [resolvable:$false] %s2624_s29 }
  0x76   : > { %1336 = vmatprep.subr.bf16.mxu1 %v2350_v33  ;;  %v291_v32 = vld [vmem:[%s2861_s30 + $0x80] sm:$0xff]  ;;  %v300_v49 = vld [vmem:[%s2861_s30 + $0xc8] sm:$0xff]  ;;  %p2627_p6 = scmp.lt.s32.totalorder %s3042_s6, %s2625_s29 }
  0x77   : > { %v295_v33 = vld [vmem:[%s2861_s30 + $0xa0] sm:$0xff]  ;;  %v304_v50 = vld [vmem:[%s2861_s30 + $0xe8] sm:$0xff]  ;;  %p2623_p2 = pneg %p2622_p1 }
  0x78   : > { %1264 = vmatpush2.bf16.msra.mxu0 %v2352_v34  ;;  %v292_v34 = vld [vmem:[%s2861_s30 + $0x88] sm:$0xff]  ;;  %v2020_v53 = vcombine.high %v300_v49, %v304_v50 }
  0x79   : > { %1337 = vmatpush2.bf16.msra.mxu1 %v2353_v35  ;;  %1265 = vmatprep.subr.bf16.mxu0 %v2354_v36  ;;  %v296_v35 = vld [vmem:[%s2861_s30 + $0xa8] sm:$0xff]  ;;  %v2422_v36 = vld [vmem:[#allocation5 + $0x234] ss:$8 sps:$4 sm:$0xff]  }
  0x7a   : > { %1338 = vmatprep.subr.bf16.mxu1 %v2356_v37  ;;  %v2010_v37 = vcombine.high %v291_v32, %v295_v33  ;;  %v2467_v19 = vld [vmem:[#allocation5 + $0x3c4] ss:$8 sps:$4 sm:$0xff]   ;;  %v2462_v20 = vld [vmem:[#allocation5 + $0x2c0] ss:$8 sps:$4 sm:$0xff]  }
  0x7c   : > { %1266 = vmatpush2.bf16.msra.mxu0 %v2358_v38  ;;  %v2012_v38 = vcombine.high %v292_v34, %v296_v35 }
  0x7d   : > { %1339 = vmatpush2.bf16.msra.mxu1 %v2359_v39  ;;  %1267 = vmatprep.subr.bf16.mxu0 %v2360_v40  ;;  %v2425_v39 = vld [vmem:[#allocation5 + $0x334] ss:$8 sps:$4 sm:$0xff]   ;;  %v2420_v40 = vld [vmem:[#allocation5 + $0x230] ss:$8 sps:$4 sm:$0xff]  }
  0x7e   : > { %1340 = vmatprep.subr.bf16.mxu1 %v2362_v41  ;;  %v2423_v41 = vld [vmem:[#allocation5 + $0x330] ss:$8 sps:$4 sm:$0xff]  }
  0x80   : > { %1268 = vmatpush2.bf16.msra.mxu0 %v2364_v42  ;;  %v2009_v42 = vcombine.low %v291_v32, %v295_v33  ;;  %v2480_v32 = vld [vmem:[#allocation5 + $0x290] ss:$8 sps:$4 sm:$0xff]  }
  0x81   : > { %1341 = vmatpush2.bf16.msra.mxu1 %v2365_v43  ;;  %1269 = vmatprep.subr.bf16.mxu0 %v2366_v44  ;;  %v2011_v43 = vcombine.low %v292_v34, %v296_v35  ;;  %v2428_v44 = vld [vmem:[#allocation5 + $0x224] ss:$8 sps:$4 sm:$0xff]   ;;  %v2483_v33 = vld [vmem:[#allocation5 + $0x390] ss:$8 sps:$4 sm:$0xff]  }
  0x82   : > { %1342 = vmatprep.subr.bf16.mxu1 %v2368_v45  ;;  %v2431_v45 = vld [vmem:[#allocation5 + $0x324] ss:$8 sps:$4 sm:$0xff]  }
  0x83   : > { %v2488_v34 = vld [vmem:[#allocation5 + $0x284] ss:$8 sps:$4 sm:$0xff]  }
  0x84   : > { %1270 = vmatpush2.bf16.msra.mxu0 %v2370_v46  ;;  %v299_v46 = vld [vmem:[%s2861_s30 + $0xc0] sm:$0xff] }
  0x85   : > { %1343 = vmatpush2.bf16.msra.mxu1 %v2371_v47  ;;  %1271 = vmatprep.subr.bf16.mxu0 %v2372_v52  ;;  %v303_v47 = vld [vmem:[%s2861_s30 + $0xe0] sm:$0xff] }
  0x86   : > { %1344 = vmatprep.subr.bf16.mxu1 %v2374_v54  ;;  %v2018_v48 = vcombine.high %v299_v46, %v303_v47  ;;  %v2429_v52 = vld [vmem:[#allocation5 + $0x320] ss:$8 sps:$4 sm:$0xff]   ;;  %v2434_v54 = vld [vmem:[#allocation5 + $0x214] ss:$8 sps:$4 sm:$0xff]   ;;  %v2491_v35 = vld [vmem:[#allocation5 + $0x384] ss:$8 sps:$4 sm:$0xff]  }
  0x88   : > { %1272 = vmatpush2.bf16.msra.mxu0 %v2376_v56  ;;  %v2432_v56 = vld [vmem:[#allocation5 + $0x210] ss:$8 sps:$4 sm:$0xff]  }
  0x89   : > { %1345 = vmatpush2.bf16.msra.mxu1 %v2377_v57  ;;  %1273 = vmatprep.subr.bf16.mxu0 %v2378_v58  ;;  %v2435_v57 = vld [vmem:[#allocation5 + $0x310] ss:$8 sps:$4 sm:$0xff]   ;;  %v2017_v58 = vcombine.low %v299_v46, %v303_v47 }
  0x8a   : > { %1346 = vmatprep.subr.bf16.mxu1 %v2380_v59  ;;  %v2019_v59 = vcombine.low %v300_v49, %v304_v50  ;;  %v293_v46 = vld [vmem:[%s2861_s30 + $0x90] sm:$0xff]  ;;  %v298_v49 = vld [vmem:[%s2861_s30 + $0xb8] sm:$0xff] }
  0x8b   : > { %v297_v47 = vld [vmem:[%s2861_s30 + $0xb0] sm:$0xff] }
  0x8c   : > { %1274 = vmatpush2.bf16.msra.mxu0 %v2382_v60  ;;  %v2440_v60 = vld [vmem:[#allocation5 + $0x204] ss:$8 sps:$4 sm:$0xff]  }
  0x8d   : > { %1347 = vmatpush2.bf16.msra.mxu1 %v2383_v61  ;;  %1275 = vmatprep.subr.bf16.mxu0 %v2384_v62  ;;  %v2443_v61 = vld [vmem:[#allocation5 + $0x304] ss:$8 sps:$4 sm:$0xff]   ;;  %v2888_v62 = vld [vmem:[%s2861_s30 + $0x10] sm:$0xff] }
  0x8e   : > { %1348 = vmatprep.subr.bf16.mxu1 %v2386_v63  ;;  %v2891_v63 = vld [vmem:[%s2861_s30 + $0x30] sm:$0xff] }
  0x90   : > { %1276 = vmatpush2.bf16.msra.mxu0 %v2388_v0  ;;  %v2894_v0 = vld [vmem:[%s2861_s30 + $0x18] sm:$0xff] }
  0x91   : > { %1349 = vmatpush2.bf16.msra.mxu1 %v2389_v1  ;;  %1277 = vmatprep.subr.bf16.mxu0 %v2390_v2  ;;  %v2897_v1 = vld [vmem:[%s2861_s30 + $0x38] sm:$0xff]  ;;  %v2438_v2 = vld [vmem:[#allocation5 + $0x200] ss:$8 sps:$4 sm:$0xff]  }
  0x92   : > { %1350 = vmatprep.subr.bf16.mxu1 %v2392_v3  ;;  %v2441_v3 = vld [vmem:[#allocation5 + $0x300] ss:$8 sps:$4 sm:$0xff]  }
  0x94   : > { %1278 = vmatpush2.bf16.msra.mxu0 %v2394_v4  ;;  %v1998_v4 = vcombine.high %v2888_v62, %v2891_v63 }
  0x95   : > { %1351 = vmatpush2.bf16.msra.mxu1 %v2395_v5  ;;  %1393 = vmatprep.subr.bf16.mxu0 %v2398_v6  ;;  %v2446_v5 = vld [vmem:[#allocation5 + $0x2f4] ss:$8 sps:$4 sm:$0xff]  }
  0x96   : > { %1466 = vmatprep.subr.bf16.mxu1 %v2401_v7  ;;  %v2449_v6 = vld [vmem:[#allocation5 + $0x3f4] ss:$8 sps:$4 sm:$0xff]   ;;  %v2000_v7 = vcombine.high %v2894_v0, %v2897_v1 }
  0x97   : > { %1280 = vmatmul.mubr.bf16.vlgmr.msra.gmra.mxu0 %v1993_v8  ;;  %v2444_v8 = vld [vmem:[#allocation5 + $0x2f0] ss:$8 sps:$4 sm:$0xff]  }
  0x98   : > { %1353 = vmatmul.mubr.bf16.vlgmr.msra.gmra.mxu1 %v1995_v9  ;;  %1394 = vmatpush1.bf16.msra.mxu0 %v2396_v10  ;;  %v2447_v9 = vld [vmem:[#allocation5 + $0x3f0] ss:$8 sps:$4 sm:$0xff]   ;;  %v2452_v10 = vld [vmem:[#allocation5 + $0x2e4] ss:$8 sps:$4 sm:$0xff]  }
  0x99   : > { %1467 = vmatpush1.bf16.msra.mxu1 %v2399_v11  ;;  %1395 = vmatprep.subr.bf16.mxu0 %v2404_v12  ;;  %v2455_v11 = vld [vmem:[#allocation5 + $0x3e4] ss:$8 sps:$4 sm:$0xff]   ;;  %v2450_v12 = vld [vmem:[#allocation5 + $0x2e0] ss:$8 sps:$4 sm:$0xff]  }
  0x9a   : > { %1468 = vmatprep.subr.bf16.mxu1 %v2407_v13  ;;  %1289 = vmatprep.mubr.bf16.mxu0 %v2002_v21  ;;  %v2453_v13 = vld [vmem:[#allocation5 + $0x3e0] ss:$8 sps:$4 sm:$0xff]  }
  0x9b   : > { %1362 = vmatprep.mubr.bf16.mxu1 %v2004_v23  ;;  %v2465_v21 = vld [vmem:[#allocation5 + $0x3c0] ss:$8 sps:$4 sm:$0xff]   ;;  %v2473_v23 = vld [vmem:[#allocation5 + $0x3b4] ss:$8 sps:$4 sm:$0xff]  }
  0x9c   : > { %1396 = vmatpush1.bf16.msra.mxu0 %v2402_v14  ;;  %v2458_v14 = vld [vmem:[#allocation5 + $0x2d4] ss:$8 sps:$4 sm:$0xff]  }
  0x9d   : > { %1469 = vmatpush1.bf16.msra.mxu1 %v2405_v15  ;;  %1397 = vmatprep.subr.bf16.mxu0 %v2410_v16  ;;  %v2461_v15 = vld [vmem:[#allocation5 + $0x3d4] ss:$8 sps:$4 sm:$0xff]   ;;  %v2456_v16 = vld [vmem:[#allocation5 + $0x2d0] ss:$8 sps:$4 sm:$0xff]  }
  0x9e   : > { %1470 = vmatprep.subr.bf16.mxu1 %v2413_v17  ;;  %v2459_v17 = vld [vmem:[#allocation5 + $0x3d0] ss:$8 sps:$4 sm:$0xff]  }
  0x9f   : > { %1290 = vmatmul.mubr.bf16.gmra.mxu0 %v2001_v26  ;;  %v2476_v26 = vld [vmem:[#allocation5 + $0x2a4] ss:$8 sps:$4 sm:$0xff]  }
  0xa0   : > { %1363 = vmatmul.mubr.bf16.gmra.mxu1 %v2003_v27  ;;  %1398 = vmatpush1.bf16.msra.mxu0 %v2408_v24  ;;  %v2468_v24 = vld [vmem:[#allocation5 + $0x2b0] ss:$8 sps:$4 sm:$0xff]   ;;  %v2479_v27 = vld [vmem:[#allocation5 + $0x3a4] ss:$8 sps:$4 sm:$0xff]  }
  0xa1   : > { %1471 = vmatpush1.bf16.msra.mxu1 %v2411_v25  ;;  %1399 = vmatprep.subr.bf16.mxu0 %v2416_v28  ;;  %v2471_v25 = vld [vmem:[#allocation5 + $0x3b0] ss:$8 sps:$4 sm:$0xff]   ;;  %v2474_v28 = vld [vmem:[#allocation5 + $0x2a0] ss:$8 sps:$4 sm:$0xff]  }
  0xa2   : > { %1472 = vmatprep.subr.bf16.mxu1 %v2419_v29  ;;  %1299 = vmatprep.mubr.bf16.mxu0 %v2010_v37  ;;  %v2477_v29 = vld [vmem:[#allocation5 + $0x3a0] ss:$8 sps:$4 sm:$0xff]  }
  0xa3   : > { %1372 = vmatprep.mubr.bf16.mxu1 %v2012_v38  ;;  %v2489_v37 = vld [vmem:[#allocation5 + $0x380] ss:$8 sps:$4 sm:$0xff]   ;;  %v285_v38 = vld [vmem:[%s2861_s30 + $0x50] sm:$0xff] }
  0xa4   : > { %1400 = vmatpush1.bf16.msra.mxu0 %v2414_v30  ;;  %v2482_v30 = vld [vmem:[#allocation5 + $0x294] ss:$8 sps:$4 sm:$0xff]  }
  0xa5   : > { %1473 = vmatpush1.bf16.msra.mxu1 %v2417_v31  ;;  %1401 = vmatprep.subr.bf16.mxu0 %v2422_v36  ;;  %v2485_v31 = vld [vmem:[#allocation5 + $0x394] ss:$8 sps:$4 sm:$0xff]   ;;  %v2486_v36 = vld [vmem:[#allocation5 + $0x280] ss:$8 sps:$4 sm:$0xff]  }
  0xa6   : > { %1474 = vmatprep.subr.bf16.mxu1 %v2425_v39  ;;  %v289_v39 = vld [vmem:[%s2861_s30 + $0x70] sm:$0xff] }
  0xa7   : > { %1300 = vmatmul.mubr.bf16.gmra.mxu0 %v2009_v42  ;;  %v1997_v42 = vcombine.low %v2888_v62, %v2891_v63  ;;  %v2005_v50 = vcombine.low %v285_v38, %v289_v39 }
  0xa8   : > { %1373 = vmatmul.mubr.bf16.gmra.mxu1 %v2011_v43  ;;  %1402 = vmatpush1.bf16.msra.mxu0 %v2420_v40  ;;  %v286_v40 = vld [vmem:[%s2861_s30 + $0x58] sm:$0xff]  ;;  %v1999_v43 = vcombine.low %v2894_v0, %v2897_v1  ;;  %v2495_v1 = vld [vmem:[#allocation7 + $0x60] ss:$8 sps:$4 sm:$0xff]  }
  0xa9   : > { %1475 = vmatpush1.bf16.msra.mxu1 %v2423_v41  ;;  %1403 = vmatprep.subr.bf16.mxu0 %v2428_v44  ;;  %v290_v41 = vld [vmem:[%s2861_s30 + $0x78] sm:$0xff]  ;;  %v2006_v44 = vcombine.high %v285_v38, %v289_v39 }
  0xaa   : > { %1476 = vmatprep.subr.bf16.mxu1 %v2431_v45  ;;  %1309 = vmatprep.mubr.bf16.mxu0 %v2018_v48  ;;  %v2008_v45 = vcombine.high %v286_v40, %v290_v41  ;;  %v294_v48 = vld [vmem:[%s2861_s30 + $0x98] sm:$0xff] }
  0xab   : > { %1382 = vmatprep.mubr.bf16.mxu1 %v2020_v53  ;;  %v2016_v53 = vcombine.high %v294_v48, %v298_v49  ;;  %v2015_v62 = vcombine.low %v294_v48, %v298_v49 }
  0xac   : > { %1404 = vmatpush1.bf16.msra.mxu0 %v2426_v51  ;;  %v2007_v51 = vcombine.low %v286_v40, %v290_v41 }
  0xad   : > { %1477 = vmatpush1.bf16.msra.mxu1 %v2429_v52  ;;  %1405 = vmatprep.subr.bf16.mxu0 %v2434_v54  ;;  %v2014_v52 = vcombine.high %v293_v46, %v297_v47  ;;  %v301_v54 = vld [vmem:[%s2861_s30 + $0xd0] sm:$0xff] }
  0xae   : > { %1478 = vmatprep.subr.bf16.mxu1 %v2437_v55  ;;  %v305_v55 = vld [vmem:[%s2861_s30 + $0xf0] sm:$0xff] }
  0xaf   : > { %1310 = vmatmul.mubr.bf16.gmra.mxu0 %v2017_v58  ;;  %v302_v58 = vld [vmem:[%s2861_s30 + $0xd8] sm:$0xff]  ;;  %v2022_v63 = vcombine.high %v301_v54, %v305_v55 }
  0xb0   : > { %1383 = vmatmul.mubr.bf16.gmra.mxu1 %v2019_v59  ;;  %1406 = vmatpush1.bf16.msra.mxu0 %v2432_v56  ;;  %v2492_v56 = vld [vmem:[#allocation7 + $0x70] ss:$8 sps:$4 sm:$0xff]  }
  0xb1   : > { %1479 = vmatpush1.bf16.msra.mxu1 %v2435_v57  ;;  %1407 = vmatprep.subr.bf16.mxu0 %v2440_v60  ;;  %v2494_v57 = vld [vmem:[#allocation7 + $0x74] ss:$8 sps:$4 sm:$0xff]   ;;  %v2497_v60 = vld [vmem:[#allocation7 + $0x64] ss:$8 sps:$4 sm:$0xff]  }
  0xb2   : > { %1480 = vmatprep.subr.bf16.mxu1 %v2443_v61  ;;  %1425 = vmatprep.mubr.bf16.mxu0 %v1998_v4  ;;  %v306_v59 = vld [vmem:[%s2861_s30 + $0xf8] sm:$0xff]  ;;  %v2013_v61 = vcombine.low %v293_v46, %v297_v47  ;;  %v2503_v4 = vld [vmem:[#allocation7 + $0x44] ss:$8 sps:$4 sm:$0xff]   ;;  %s2626_s30 = scalar_lea.vmem %s2625_s29, 4096 }
  0xb3   : > { %1498 = vmatprep.mubr.bf16.mxu1 %v2000_v7  ;;  %v2024_v0 = vcombine.high %v302_v58, %v306_v59  ;;  %v2501_v7 = vld [vmem:[#allocation7 + $0x40] ss:$8 sps:$4 sm:$0xff]   ;;  %p2628_p12 = scmp.lt.s32.totalorder %s2626_s30, %s2620_s14 }
  0xb4   : > { %1408 = vmatpush1.bf16.msra.mxu0 %v2438_v2  ;;  %v2500_v2 = vld [vmem:[#allocation7 + $0x54] ss:$8 sps:$4 sm:$0xff]  }
  0xb5   : > { %1481 = vmatpush1.bf16.msra.mxu1 %v2441_v3  ;;  %1409 = vmatprep.subr.bf16.mxu0 %v2446_v5  ;;  %v2498_v3 = vld [vmem:[#allocation7 + $0x50] ss:$8 sps:$4 sm:$0xff]   ;;  %v2021_v5 = vcombine.low %v301_v54, %v305_v55  ;;  %v437_v54 = vlaneseq  ;;  %p2629_p7 = por %p2628_p12, %p2627_p6 }
  0xb6   : > { %1482 = vmatprep.subr.bf16.mxu1 %v2449_v6  ;;  %v2023_v6 = vcombine.low %v302_v58, %v306_v59 }
  0xb7   : > { %p2630_p9 = pnand %p2629_p7, %p2623_p2 }
  0xb8   : > { %1410 = vmatpush2.bf16.msra.mxu0 %v2444_v8  ;;  %v2506_v8 = vld [vmem:[#allocation7 + $0x34] ss:$8 sps:$4 sm:$0xff]  }
  0xb9   : > { %1483 = vmatpush2.bf16.msra.mxu1 %v2447_v9  ;;  %1411 = vmatprep.subr.bf16.mxu0 %v2452_v10  ;;  %v2504_v9 = vld [vmem:[#allocation7 + $0x30] ss:$8 sps:$4 sm:$0xff]   ;;  %v2509_v10 = vld [vmem:[#allocation7 + $0x24] ss:$8 sps:$4 sm:$0xff]  }
  0xba   : > { %1484 = vmatprep.subr.bf16.mxu1 %v2455_v11  ;;  %v2507_v11 = vld [vmem:[#allocation7 + $0x20] ss:$8 sps:$4 sm:$0xff]  }
  0xbc   : > { %1412 = vmatpush2.bf16.msra.mxu0 %v2450_v12  ;;  %v2512_v12 = vld [vmem:[#allocation7 + $0x14] ss:$8 sps:$4 sm:$0xff]  }
  0xbd   : > { %1485 = vmatpush2.bf16.msra.mxu1 %v2453_v13  ;;  %1413 = vmatprep.subr.bf16.mxu0 %v2458_v14  ;;  %v2510_v13 = vld [vmem:[#allocation7 + $0x10] ss:$8 sps:$4 sm:$0xff]   ;;  %v2515_v14 = vld [vmem:[#allocation7 + $0x4] ss:$8 sps:$4 sm:$0xff]  }
  0xbe   : > { %1486 = vmatprep.subr.bf16.mxu1 %v2461_v15  ;;  %v2513_v15 = vld [vmem:[#allocation7] ss:$8 sps:$4 sm:$0xff]  }
  0xc0   : > { %1414 = vmatpush2.bf16.msra.mxu0 %v2456_v16  ;;  %v2518_v16 = vld [vmem:[#allocation7 + $0xf4] ss:$8 sps:$4 sm:$0xff]  }
  0xc1   : > { %1487 = vmatpush2.bf16.msra.mxu1 %v2459_v17  ;;  %1415 = vmatprep.subr.bf16.mxu0 %v2464_v18  ;;  %v2516_v17 = vld [vmem:[#allocation7 + $0xf0] ss:$8 sps:$4 sm:$0xff]   ;;  %v2521_v18 = vld [vmem:[#allocation7 + $0xe4] ss:$8 sps:$4 sm:$0xff]  }
  0xc2   : > { %1488 = vmatprep.subr.bf16.mxu1 %v2467_v19  ;;  %v2519_v19 = vld [vmem:[#allocation7 + $0xe0] ss:$8 sps:$4 sm:$0xff]  }
  0xc4   : > { %1416 = vmatpush2.bf16.msra.mxu0 %v2462_v20  ;;  %v2524_v20 = vld [vmem:[#allocation7 + $0xd4] ss:$8 sps:$4 sm:$0xff]  }
  0xc5   : > { %1489 = vmatpush2.bf16.msra.mxu1 %v2465_v21  ;;  %1417 = vmatprep.subr.bf16.mxu0 %v2470_v22  ;;  %v2522_v21 = vld [vmem:[#allocation7 + $0xd0] ss:$8 sps:$4 sm:$0xff]   ;;  %v2527_v22 = vld [vmem:[#allocation7 + $0xc4] ss:$8 sps:$4 sm:$0xff]  }
  0xc6   : > { %1490 = vmatprep.subr.bf16.mxu1 %v2473_v23  ;;  %v2525_v23 = vld [vmem:[#allocation7 + $0xc0] ss:$8 sps:$4 sm:$0xff]  }
  0xc8   : > { %1418 = vmatpush2.bf16.msra.mxu0 %v2468_v24  ;;  %v2530_v24 = vld [vmem:[#allocation7 + $0xb4] ss:$8 sps:$4 sm:$0xff]  }
  0xc9   : > { %1491 = vmatpush2.bf16.msra.mxu1 %v2471_v25  ;;  %1419 = vmatprep.subr.bf16.mxu0 %v2476_v26  ;;  %v2528_v25 = vld [vmem:[#allocation7 + $0xb0] ss:$8 sps:$4 sm:$0xff]   ;;  %v2533_v26 = vld [vmem:[#allocation7 + $0xa4] ss:$8 sps:$4 sm:$0xff]  }
  0xca   : > { %1492 = vmatprep.subr.bf16.mxu1 %v2479_v27  ;;  %v2531_v27 = vld [vmem:[#allocation7 + $0xa0] ss:$8 sps:$4 sm:$0xff]  }
  0xcc   : > { %1420 = vmatpush2.bf16.msra.mxu0 %v2474_v28  ;;  %v2536_v28 = vld [vmem:[#allocation7 + $0x94] ss:$8 sps:$4 sm:$0xff]  }
  0xcd   : > { %1493 = vmatpush2.bf16.msra.mxu1 %v2477_v29  ;;  %1421 = vmatprep.subr.bf16.mxu0 %v2482_v30  ;;  %v2534_v29 = vld [vmem:[#allocation7 + $0x90] ss:$8 sps:$4 sm:$0xff]   ;;  %v2539_v30 = vld [vmem:[#allocation7 + $0x84] ss:$8 sps:$4 sm:$0xff]  }
  0xce   : > { %1494 = vmatprep.subr.bf16.mxu1 %v2485_v31  ;;  %v2537_v31 = vld [vmem:[#allocation7 + $0x80] ss:$8 sps:$4 sm:$0xff]  }
  0xd0   : > { %1422 = vmatpush2.bf16.msra.mxu0 %v2480_v32 }
  0xd1   : > { %1495 = vmatpush2.bf16.msra.mxu1 %v2483_v33  ;;  %1423 = vmatprep.subr.bf16.mxu0 %v2488_v34 }
  0xd2   : > { %1496 = vmatprep.subr.bf16.mxu1 %v2491_v35 }
  0xd4   : > { %1424 = vmatpush2.bf16.msra.mxu0 %v2486_v36 }
  0xd5   : > { %1497 = vmatpush2.bf16.msra.mxu1 %v2489_v37  ;;  %1767 = vmatprep.subr.bf16.mxu0 %v2494_v57 }
  0xd6   : > { %2195 = vmatprep.subr.bf16.mxu1 %v2494_v57  ;;  %v2937_v57 = vshrl.u32 %v437_v54, 7 }
  0xd7   : > { %1426 = vmatmul.mubr.bf16.vlgmr.msra.gmra.mxu0 %v1997_v42 }
  0xd8   : > { %1499 = vmatmul.mubr.bf16.vlgmr.msra.gmra.mxu1 %v1999_v43  ;;  %1435 = vmatprep.mubr.bf16.mxu0 %v2006_v44 }
  0xd9   : > { %1508 = vmatprep.mubr.bf16.mxu1 %v2008_v45  ;;  %1768 = vmatpush1.bf16.msra.mxu0 %v2492_v56 }
  0xda   : > { %2211 = vmatpush1.bf16.msra.mxu1 %v2492_v56  ;;  %1769 = vmatprep.subr.bf16.mxu0 %v2497_v60 }
  0xdb   : > { %2196 = vmatprep.subr.bf16.mxu1 %v2497_v60  ;;  %v443_v60 = vsub.s32 1, %v2937_v57 }
  0xdd   : > { %1770 = vmatpush1.bf16.msra.mxu0 %v2495_v1 }
  0xde   : > { %2212 = vmatpush1.bf16.msra.mxu1 %v2495_v1  ;;  %1771 = vmatprep.subr.bf16.mxu0 %v2500_v2 }
  0xdf   : > { %1436 = vmatmul.mubr.bf16.gmra.mxu0 %v2005_v50  ;;  %2197 = vmatprep.subr.bf16.mxu1 %v2500_v2 }
  0xe0   : > { %1509 = vmatmul.mubr.bf16.gmra.mxu1 %v2007_v51  ;;  %1445 = vmatprep.mubr.bf16.mxu0 %v2014_v52 }
  0xe1   : > { %1518 = vmatprep.mubr.bf16.mxu1 %v2016_v53  ;;  %1772 = vmatpush1.bf16.msra.mxu0 %v2498_v3 }
  0xe2   : > { %2213 = vmatpush1.bf16.msra.mxu1 %v2498_v3  ;;  %1773 = vmatprep.subr.bf16.mxu0 %v2503_v4 }
  0xe3   : > { %2198 = vmatprep.subr.bf16.mxu1 %v2503_v4 }
  0xe5   : > { %1774 = vmatpush1.bf16.msra.mxu0 %v2501_v7 }
  0xe6   : > { %2214 = vmatpush1.bf16.msra.mxu1 %v2501_v7  ;;  %1775 = vmatprep.subr.bf16.mxu0 %v2506_v8 }
  0xe7   : > { %1446 = vmatmul.mubr.bf16.gmra.mxu0 %v2013_v61  ;;  %2199 = vmatprep.subr.bf16.mxu1 %v2506_v8  ;;  %v435_v61 = vld [vmem:[%s3089_s2] sm:$0x3] }
  0xe8   : > { %1519 = vmatmul.mubr.bf16.gmra.mxu1 %v2015_v62  ;;  %1455 = vmatprep.mubr.bf16.mxu0 %v2022_v63  ;;  %v439_v62 = vsub.s32 0, %v2937_v57  ;;  %v2954_v1 = vrot.slane %v435_v61, %v443_v60 }
  0xe9   : > { %1528 = vmatprep.mubr.bf16.mxu1 %v2024_v0  ;;  %1776 = vmatpush1.bf16.msra.mxu0 %v2504_v9 }
  0xea   : > { %2215 = vmatpush1.bf16.msra.mxu1 %v2504_v9  ;;  %1777 = vmatprep.subr.bf16.mxu0 %v2509_v10  ;;  %v2958_v2 = vrot.slane %v435_v61, %v439_v62 }
  0xeb   : > { %2200 = vmatprep.subr.bf16.mxu1 %v2509_v10 }
  0xed   : > { %1778 = vmatpush1.bf16.msra.mxu0 %v2507_v11 }
  0xee   : > { %2216 = vmatpush1.bf16.msra.mxu1 %v2507_v11  ;;  %1779 = vmatprep.subr.bf16.mxu0 %v2512_v12 }
  0xef   : > { %1456 = vmatmul.mubr.bf16.gmra.mxu0 %v2021_v5  ;;  %2201 = vmatprep.subr.bf16.mxu1 %v2512_v12 }
  0xf0   : > { %1529 = vmatmul.mubr.bf16.gmra.mxu1 %v2023_v6 }
  0xf1   : > { %1780 = vmatpush1.bf16.msra.mxu0 %v2510_v13 }
  0xf2   : > { %2217 = vmatpush1.bf16.msra.mxu1 %v2510_v13  ;;  %1781 = vmatprep.subr.bf16.mxu0 %v2515_v14 }
  0xf3   : > { %2202 = vmatprep.subr.bf16.mxu1 %v2515_v14 }
  0xf5   : > { %1782 = vmatpush1.bf16.msra.mxu0 %v2513_v15 }
  0xf6   : > { %2218 = vmatpush1.bf16.msra.mxu1 %v2513_v15  ;;  %1783 = vmatprep.subr.bf16.mxu0 %v2518_v16 }
  0xf7   : > { %2203 = vmatprep.subr.bf16.mxu1 %v2518_v16 }
  0xf9   : > { %1784 = vmatpush2.bf16.msra.mxu0 %v2516_v17 }
  0xfa   : > { %2219 = vmatpush2.bf16.msra.mxu1 %v2516_v17  ;;  %1785 = vmatprep.subr.bf16.mxu0 %v2521_v18 }
  0xfb   : > { %2204 = vmatprep.subr.bf16.mxu1 %v2521_v18 }
  0xfd   : > { %1786 = vmatpush2.bf16.msra.mxu0 %v2519_v19 }
  0xfe   : > { %2220 = vmatpush2.bf16.msra.mxu1 %v2519_v19  ;;  %1787 = vmatprep.subr.bf16.mxu0 %v2524_v20 }
  0xff   : > { %2205 = vmatprep.subr.bf16.mxu1 %v2524_v20 }
 0x101   : > { %1788 = vmatpush2.bf16.msra.mxu0 %v2522_v21 }
 0x102   : > { %2221 = vmatpush2.bf16.msra.mxu1 %v2522_v21  ;;  %1789 = vmatprep.subr.bf16.mxu0 %v2527_v22 }
 0x103   : > { %2206 = vmatprep.subr.bf16.mxu1 %v2527_v22 }
 0x105   : > { %1790 = vmatpush2.bf16.msra.mxu0 %v2525_v23 }
 0x106   : > { %2222 = vmatpush2.bf16.msra.mxu1 %v2525_v23  ;;  %1791 = vmatprep.subr.bf16.mxu0 %v2530_v24 }
 0x107   : > { %2207 = vmatprep.subr.bf16.mxu1 %v2530_v24 }
 0x109   : > { %1792 = vmatpush2.bf16.msra.mxu0 %v2528_v25 }
 0x10a   : > { %2223 = vmatpush2.bf16.msra.mxu1 %v2528_v25  ;;  %1793 = vmatprep.subr.bf16.mxu0 %v2533_v26 }
 0x10b   : > { %2208 = vmatprep.subr.bf16.mxu1 %v2533_v26 }
 0x10d   : > { %1794 = vmatpush2.bf16.msra.mxu0 %v2531_v27 }
 0x10e   : > { %2224 = vmatpush2.bf16.msra.mxu1 %v2531_v27  ;;  %1795 = vmatprep.subr.bf16.mxu0 %v2536_v28 }
 0x10f   : > { %2209 = vmatprep.subr.bf16.mxu1 %v2536_v28 }
 0x111   : > { %1796 = vmatpush2.bf16.msra.mxu0 %v2534_v29 }
 0x112   : > { %2225 = vmatpush2.bf16.msra.mxu1 %v2534_v29  ;;  %1797 = vmatprep.subr.bf16.mxu0 %v2539_v30 }
 0x113   : > { %2210 = vmatprep.subr.bf16.mxu1 %v2539_v30 }
 0x115   : > { %1798 = vmatpush2.bf16.msra.mxu0 %v2537_v31 }
 0x116   : > { %2226 = vmatpush2.bf16.msra.mxu1 %v2537_v31 }
 0x157   : > { %v1281_v32 = vpop.f32.mrf.mxu0 }
 0x158   : > { %v1354_v33 = vpop.f32.mrf.mxu1  ;;  %v1282_v6 = vadd.f32 %v1281_v32, %v2958_v2 }
 0x159   : > { %v1283_v34 = vpop.f32.mrf.mxu0 }
 0x15a   : > { %v1356_v35 = vpop.f32.mrf.mxu1  ;;  %v1284_v5 = vadd.f32 %v1283_v34, %v2954_v1  ;;  %v1355_v14 = vadd.f32 %v1354_v33, %v1282_v6 }
 0x15b   : > { %v1285_v36 = vpop.f32.mrf.mxu0 }
 0x15c   : > { %v1358_v37 = vpop.f32.mrf.mxu1  ;;  %v1286_v9 = vadd.f32 %v1285_v36, %v2958_v2  ;;  %v1357_v12 = vadd.f32 %v1356_v35, %v1284_v5 }
 0x15d   : > { %v1287_v38 = vpop.f32.mrf.mxu0 }
 0x15e   : > { %v1360_v39 = vpop.f32.mrf.mxu1  ;;  %v1288_v13 = vadd.f32 %v1287_v38, %v2954_v1  ;;  %v1359_v17 = vadd.f32 %v1358_v37, %v1286_v9 }
 0x15f   : > { %v1291_v40 = vpop.f32.mrf.mxu0 }
 0x160   : > { %v1364_v41 = vpop.f32.mrf.mxu1  ;;  %v1361_v22 = vadd.f32 %v1360_v39, %v1288_v13  ;;  %v1292_v25 = vadd.f32 %v1291_v40, %v2958_v2 }
 0x161   : > { %v1293_v42 = vpop.f32.mrf.mxu0 }
 0x162   : > { %v1366_v43 = vpop.f32.mrf.mxu1  ;;  %v1294_v23 = vadd.f32 %v1293_v42, %v2954_v1  ;;  %v1365_v38 = vadd.f32 %v1364_v41, %v1292_v25 }
 0x163   : > { %v1295_v44 = vpop.f32.mrf.mxu0 }
 0x164   : > { %v1368_v45 = vpop.f32.mrf.mxu1  ;;  %v1296_v28 = vadd.f32 %v1295_v44, %v2958_v2  ;;  %v1367_v35 = vadd.f32 %v1366_v43, %v1294_v23 }
 0x165   : > { %v1297_v46 = vpop.f32.mrf.mxu0 }
 0x166   : > { %v2919_v47 = vpop.f32.mrf.mxu1  ;;  %v1298_v36 = vadd.f32 %v1297_v46, %v2954_v1  ;;  %v1369_v61 = vadd.f32 %v1368_v45, %v1296_v28 }
 0x167   : > { %v2921_v48 = vpop.f32.mrf.mxu0 }
 0x168   : > { %v2923_v49 = vpop.f32.mrf.mxu1  ;;  %v1302_v41 = vadd.f32 %v2921_v48, %v2958_v2 }
 0x169   : > { %v2925_v50 = vpop.f32.mrf.mxu0 }
 0x16a   : > { %v2927_v51 = vpop.f32.mrf.mxu1  ;;  %v1304_v43 = vadd.f32 %v2925_v50, %v2954_v1  ;;  %v1375_v23 = vadd.f32 %v2923_v49, %v1302_v41 }
 0x16b   : > { %v2929_v52 = vpop.f32.mrf.mxu0 }
 0x16c   : > { %v2931_v53 = vpop.f32.mrf.mxu1  ;;  %v1377_v50 = vadd.f32 %v2927_v51, %v1304_v43 }
 0x16d   : > { %v2933_v55 = vpop.f32.mrf.mxu0 }
 0x16e   : > { %v2935_v56 = vpop.f32.mrf.mxu1 }
 0x16f   : > { %v2939_v58 = vpop.f32.mrf.mxu0 }
 0x170   : > { %v2941_v59 = vpop.f32.mrf.mxu1  ;;  %v1312_v49 = vadd.f32 %v2939_v58, %v2958_v2 }
 0x171   : > { %v2948_v63 = vpop.f32.mrf.mxu0 }
 0x172   : > { %v2950_v0 = vpop.f32.mrf.mxu1 }
 0x173   : > { %v2960_v3 = vpop.f32.mrf.mxu0 }
 0x174   : > { %v2962_v4 = vpop.f32.mrf.mxu1 }
 0x175   : > { %v2966_v7 = vpop.f32.mrf.mxu0 }
 0x176   : > { %v2968_v8 = vpop.f32.mrf.mxu1 }
 0x197   : > { %v1427_v10 = vpop.f32.mrf.mxu0 }
 0x198   : > { %v1500_v11 = vpop.f32.mrf.mxu1  ;;  %v1428_v19 = vadd.f32 %v1427_v10, %v1355_v14 }
 0x199   : > { %v1429_v15 = vpop.f32.mrf.mxu0 }
 0x19a   : > { %v1502_v16 = vpop.f32.mrf.mxu1  ;;  %v1430_v18 = vadd.f32 %v1429_v15, %v1357_v12  ;;  %v1501_v32 = vadd.f32 %v1500_v11, %v1428_v19  ;;  %v1371_v11 = vadd.f32 %v2919_v47, %v1298_v36 }
 0x19b   : > { %v1431_v20 = vpop.f32.mrf.mxu0 }
 0x19c   : > { %v1504_v21 = vpop.f32.mrf.mxu1  ;;  %v1432_v24 = vadd.f32 %v1431_v20, %v1359_v17  ;;  %v1503_v29 = vadd.f32 %v1502_v16, %v1430_v18  ;;  %v1539_v9 = vmax.f32 %v1501_v32, 0.0  ;;  %v1306_v16 = vadd.f32 %v2929_v52, %v2958_v2 }
 0x19d   : > { %v1433_v26 = vpop.f32.mrf.mxu0 }
 0x19e   : > { %v1506_v27 = vpop.f32.mrf.mxu1  ;;  %v1505_v30 = vadd.f32 %v1504_v21, %v1432_v24  ;;  %v1434_v31 = vadd.f32 %v1433_v26, %v1361_v22  ;;  %v1540_v40 = vmax.f32 %v1503_v29, 0.0  ;;  %v1308_v22 = vadd.f32 %v2933_v55, %v2954_v1 }
 0x19f   : > { %v1437_v33 = vpop.f32.mrf.mxu0  ;;  %v1379_v52 = vadd.f32 %v2931_v53, %v1306_v16  ;;  %v1314_v55 = vadd.f32 %v2948_v63, %v2954_v1 }
 0x1a0   : > { %v1510_v34 = vpop.f32.mrf.mxu1  ;;  %v1507_v37 = vadd.f32 %v1506_v27, %v1434_v31  ;;  %v1541_v39 = vmax.f32 %v1505_v30, 0.0  ;;  %v1438_v44 = vadd.f32 %v1437_v33, %v1365_v38  ;;  %v1381_v51 = vadd.f32 %v2935_v56, %v1308_v22 }
 0x1a1   : > { %v1439_v42 = vpop.f32.mrf.mxu0  ;;  %v1316_v38 = vadd.f32 %v2960_v3, %v2958_v2  ;;  %v1387_v63 = vadd.f32 %v2950_v0, %v1314_v55 }
 0x1a2   : > { %v1512_v54 = vpop.f32.mrf.mxu1  ;;  %v1542_v5 = vmax.f32 %v1507_v37, 0.0  ;;  %v1440_v6 = vadd.f32 %v1439_v42, %v1367_v35  ;;  %v1555_v14 = vpack.c.bf16 %v1541_v39, %v1539_v9  ;;  %v1511_v20 = vadd.f32 %v1510_v34, %v1438_v44 }
 0x1a3   : > { %v1441_v10 = vpop.f32.mrf.mxu0  ;;  %v1389_v2 = vadd.f32 %v2962_v4, %v1316_v38 }
 0x1a4   : > { %v1514_v12 = vpop.f32.mrf.mxu1  ;;  %v1556_v13 = vpack.c.bf16 %v1542_v5, %v1540_v40  ;;  %v1442_v46 = vadd.f32 %v1441_v10, %v1369_v61  ;;  %v1513_v17 = vadd.f32 %v1512_v54, %v1440_v6  ;;  %v1543_v30 = vmax.f32 %v1511_v20, 0.0 }
 0x1a5   : > { %v1443_v15 = vpop.f32.mrf.mxu0  ;;  %v1318_v5 = vadd.f32 %v2966_v7, %v2954_v1  ;;  %v1385_v6 = vadd.f32 %v2941_v59, %v1312_v49 }
 0x1a6   : > { %v1516_v45 = vpop.f32.mrf.mxu1  ;;  %v1515_v18 = vadd.f32 %v1514_v12, %v1442_v46  ;;  %v1444_v19 = vadd.f32 %v1443_v15, %v1371_v11  ;;  %1799 = vmatprep.mubr.bf16.mxu0 %v1556_v13  ;;  %v1544_v27 = vmax.f32 %v1513_v17, 0.0 }
 0x1a7   : > { %v1447_v47 = vpop.f32.mrf.mxu0  ;;  %1800 = vmatmul.mubr.bf16.vlgmr.msra.gmra.mxu0 %v1555_v14  ;;  %v1391_v0 = vadd.f32 %v2968_v8, %v1318_v5  ;;  %v1595_v8 = vld [vmem:[%s3091_s4] sm:$0x3] }
 0x1a8   : > { %v1520_v21 = vpop.f32.mrf.mxu1  ;;  %v1517_v48 = vadd.f32 %v1516_v45, %v1444_v19  ;;  %v1545_v24 = vmax.f32 %v1515_v18, 0.0  ;;  %v1448_v31 = vadd.f32 %v1447_v47, %v1375_v23  ;;  %v3009_v23 = vrot.slane %v1595_v8, %v443_v60 }
 0x1a9   : > { %v1449_v25 = vpop.f32.mrf.mxu0 }
 0x1aa   : > { %v1522_v26 = vpop.f32.mrf.mxu1  ;;  %v1546_v28 = vmax.f32 %v1517_v48, 0.0  ;;  %v1450_v29 = vadd.f32 %v1449_v25, %v1377_v50  ;;  %v1557_v36 = vpack.c.bf16 %v1545_v24, %v1543_v30  ;;  %v1521_v61 = vadd.f32 %v1520_v21, %v1448_v31 }
 0x1ab   : > { %v1451_v32 = vpop.f32.mrf.mxu0  ;;  %v1600_v48 = vrot.slane %v1595_v8, %v439_v62 }
 0x1ac   : > { %v1524_v33 = vpop.f32.mrf.mxu1  ;;  %v1558_v34 = vpack.c.bf16 %v1546_v28, %v1544_v27  ;;  %v1452_v35 = vadd.f32 %v1451_v32, %v1379_v52  ;;  %v1523_v39 = vadd.f32 %v1522_v26, %v1450_v29  ;;  %v1547_v43 = vmax.f32 %v1521_v61, 0.0 }
 0x1ad   : > { %v1453_v37 = vpop.f32.mrf.mxu0 }
 0x1ae   : > { %v1526_v53 = vpop.f32.mrf.mxu1  ;;  %v1525_v42 = vadd.f32 %v1524_v33, %v1452_v35  ;;  %v1454_v54 = vadd.f32 %v1453_v37, %v1381_v51  ;;  %1809 = vmatprep.mubr.bf16.mxu0 %v1558_v34  ;;  %v1548_v3 = vmax.f32 %v1523_v39, 0.0 }
 0x1af   : > { %v1457_v56 = vpop.f32.mrf.mxu0  ;;  %1810 = vmatmul.mubr.bf16.gmra.mxu0 %v1557_v36 }
 0x1b0   : > { %v1530_v40 = vpop.f32.mrf.mxu1  ;;  %v1527_v58 = vadd.f32 %v1526_v53, %v1454_v54  ;;  %v1549_v9 = vmax.f32 %v1525_v42, 0.0  ;;  %v1458_v13 = vadd.f32 %v1457_v56, %v1385_v6 }
 0x1b1   : > { %v1459_v44 = vpop.f32.mrf.mxu0 }
 0x1b2   : > { %v1532_v10 = vpop.f32.mrf.mxu1  ;;  %v1550_v12 = vmax.f32 %v1527_v58, 0.0  ;;  %v1460_v11 = vadd.f32 %v1459_v44, %v1387_v63  ;;  %v1559_v1 = vpack.c.bf16 %v1549_v9, %v1547_v43  ;;  %v1531_v17 = vadd.f32 %v1530_v40, %v1458_v13 }
 0x1b3   : > { %v1461_v46 = vpop.f32.mrf.mxu0 }
 0x1b4   : > { %v1534_v41 = vpop.f32.mrf.mxu1  ;;  %v1560_v14 = vpack.c.bf16 %v1550_v12, %v1548_v3  ;;  %v1462_v15 = vadd.f32 %v1461_v46, %v1389_v2  ;;  %v1533_v45 = vadd.f32 %v1532_v10, %v1460_v11  ;;  %v1551_v21 = vmax.f32 %v1531_v17, 0.0 }
 0x1b5   : > { %v1463_v7 = vpop.f32.mrf.mxu0 }
 0x1b6   : > { %v1535_v59 = vadd.f32 %v1534_v41, %v1462_v15  ;;  %v1464_v16 = vadd.f32 %v1463_v7, %v1391_v0  ;;  %1819 = vmatprep.mubr.bf16.mxu1 %v1560_v14  ;;  %v1536_v4 = vpop.f32.mrf.mxu1  ;;  %v1552_v20 = vmax.f32 %v1533_v45, 0.0 }
 0x1b7   : > { %1820 = vmatmul.mubr.bf16.vlgmr.msra.gmra.mxu1 %v1559_v1 }
 0x1b8   : > { %v1537_v18 = vadd.f32 %v1536_v4, %v1464_v16  ;;  %v1553_v19 = vmax.f32 %v1535_v59, 0.0 }
 0x1ba   : > { %v1554_v47 = vmax.f32 %v1537_v18, 0.0  ;;  %v1561_v22 = vpack.c.bf16 %v1553_v19, %v1551_v21 }
 0x1bc   : > { %v1562_v50 = vpack.c.bf16 %v1554_v47, %v1552_v20 }
 0x1be   : > { %1829 = vmatprep.mubr.bf16.mxu1 %v1562_v50 }
 0x1bf   : > { %1830 = vmatmul.mubr.bf16.gmra.mxu1 %v1561_v22 }
 0x267   : > { %v1801_v24 = vpop.f32.mrf.mxu0 }
 0x268   : > { %v1802_v25 = vadd.f32 %v1801_v24, %v1600_v48 }
 0x269   : > { %v1803_v26 = vpop.f32.mrf.mxu0 }
 0x26a   : > { %v1840_v52 = vmax.f32 %v1802_v25, 0.0  ;;  %v1804_v27 = vadd.f32 %v1803_v26, %v3009_v23 }
 0x26b   : > { %v1805_v28 = vpop.f32.mrf.mxu0 }
 0x26c   : > { %1856 = vst [vmem:[%s3012_s12] sm:$0xff] %v1840_v52  ;;  %v1841_v62 = vmax.f32 %v1804_v27, 0.0  ;;  %v1806_v29 = vadd.f32 %v1805_v28, %v1600_v48 }
 0x26d   : > { %v1807_v57 = vpop.f32.mrf.mxu0 }
 0x26e   : > { %1857 = vst [vmem:[%s3012_s12 + $0x8] sm:$0xff] %v1841_v62  ;;  %v1842_v60 = vmax.f32 %v1806_v29, 0.0  ;;  %v1808_v30 = vadd.f32 %v1807_v57, %v3009_v23 }
 0x26f   : > { %v1811_v31 = vpop.f32.mrf.mxu0 }
 0x270   : > { %1858 = vst [vmem:[%s3012_s12 + $0x10] sm:$0xff] %v1842_v60  ;;  %v1843_v32 = vmax.f32 %v1808_v30, 0.0  ;;  %v1812_v33 = vadd.f32 %v1811_v31, %v1600_v48 }
 0x271   : > { %v1813_v51 = vpop.f32.mrf.mxu0 }
 0x272   : > { %1859 = vst [vmem:[%s3012_s12 + $0x18] sm:$0xff] %v1843_v32  ;;  %v1844_v55 = vmax.f32 %v1812_v33, 0.0  ;;  %v1814_v34 = vadd.f32 %v1813_v51, %v3009_v23 }
 0x273   : > { %v1815_v35 = vpop.f32.mrf.mxu0 }
 0x274   : > { %1860 = vst [vmem:[%s3012_s12 + $0x20] sm:$0xff] %v1844_v55  ;;  %v1845_v49 = vmax.f32 %v1814_v34, 0.0  ;;  %v1816_v36 = vadd.f32 %v1815_v35, %v1600_v48 }
 0x275   : > { %v1817_v37 = vpop.f32.mrf.mxu0 }
 0x276   : > { %1861 = vst [vmem:[%s3012_s12 + $0x28] sm:$0xff] %v1845_v49  ;;  %v1846_v53 = vmax.f32 %v1816_v36, 0.0  ;;  %v1818_v38 = vadd.f32 %v1817_v37, %v3009_v23 }
 0x277   : > { %v1821_v39 = vpop.f32.mrf.mxu1 }
 0x278   : > { %1862 = vst [vmem:[%s3012_s12 + $0x30] sm:$0xff] %v1846_v53  ;;  %v1847_v42 = vmax.f32 %v1818_v38, 0.0  ;;  %v1822_v54 = vadd.f32 %v1821_v39, %v1600_v48 }
 0x279   : > { %v1823_v61 = vpop.f32.mrf.mxu1 }
 0x27a   : > { %1863 = vst [vmem:[%s3012_s12 + $0x38] sm:$0xff] %v1847_v42  ;;  %v1848_v56 = vmax.f32 %v1822_v54, 0.0  ;;  %v1824_v40 = vadd.f32 %v1823_v61, %v3009_v23 }
 0x27b   : > { %v1825_v63 = vpop.f32.mrf.mxu1 }
 0x27c   : > { %1864 = vst [vmem:[%s3012_s12 + $0x40] sm:$0xff] %v1848_v56  ;;  %v1849_v5 = vmax.f32 %v1824_v40, 0.0  ;;  %v1826_v58 = vadd.f32 %v1825_v63, %v1600_v48 }
 0x27d   : > { %v1827_v6 = vpop.f32.mrf.mxu1 }
 0x27e   : > { %1865 = vst [vmem:[%s3012_s12 + $0x48] sm:$0xff] %v1849_v5  ;;  %v1850_v9 = vmax.f32 %v1826_v58, 0.0  ;;  %v1828_v44 = vadd.f32 %v1827_v6, %v3009_v23 }
 0x27f   : > { %v1831_v10 = vpop.f32.mrf.mxu1 }
 0x280   : > { %1866 = vst [vmem:[%s3012_s12 + $0x50] sm:$0xff] %v1850_v9  ;;  %v1851_v2 = vmax.f32 %v1828_v44, 0.0  ;;  %v1832_v3 = vadd.f32 %v1831_v10, %v1600_v48 }
 0x281   : > { %v1833_v12 = vpop.f32.mrf.mxu1 }
 0x282   : > { %1867 = vst [vmem:[%s3012_s12 + $0x58] sm:$0xff] %v1851_v2  ;;  %v1852_v11 = vmax.f32 %v1832_v3, 0.0  ;;  %v1834_v43 = vadd.f32 %v1833_v12, %v3009_v23 }
 0x283   : > { %v1835_v13 = vpop.f32.mrf.mxu1 }
 0x284   : > { %1868 = vst [vmem:[%s3012_s12 + $0x60] sm:$0xff] %v1852_v11  ;;  %v1853_v46 = vmax.f32 %v1834_v43, 0.0  ;;  %v1836_v41 = vadd.f32 %v1835_v13, %v1600_v48 }
 0x285   : > { %v1837_v0 = vpop.f32.mrf.mxu1 }
 0x286   : > { %1869 = vst [vmem:[%s3012_s12 + $0x68] sm:$0xff] %v1853_v46  ;;  %v1854_v14 = vmax.f32 %v1836_v41, 0.0  ;;  %v1838_v15 = vadd.f32 %v1837_v0, %v3009_v23 }
 0x288   : > { %1870 = vst [vmem:[%s3012_s12 + $0x70] sm:$0xff] %v1854_v14  ;;  %v1855_v1 = vmax.f32 %v1838_v15, 0.0 }
 0x28a   : > { %1871 = vst [vmem:[%s3012_s12 + $0x78] sm:$0xff] %v1855_v1 }
 0x28b   : > { %2633 = shalt.err (!%p2630_p9)
}
 0x28c   : > { %s2634_s24 = scalar_lea.hbm %s3040_s13, 2048  ;;  %s2638_s10 = scalar_lea.hbm %s3092_s5, 4096 }
 0x28d   : > { %p2635_p13 = scmp.ne.s32.totalorder %s3040_s13, %s2634_s24  ;;  %p2639_p4 = scmp.lt.s32.totalorder %s3040_s13, %s3092_s5 }
 0x28e   : > { %p2640_p8 = scmp.lt.s32.totalorder %s2638_s10, %s2634_s24 }
 0x28f   : > { %p2636_p5 = pnand %p2635_p13, %p3108_p10 }
 0x290   : > { %p2641_p3 = por %p2640_p8, %p2639_p4 }
 0x291   : > { %p2637_p0 = pneg %p2636_p5 }
 0x293   : > { %p2642_p11 = pnand %p2641_p3, %p2637_p0 }
 0x295   : > { %2645 = shalt.err (!%p2642_p11)
}
 0x296   : > { %s2698_s28 = smov 256   ;;  %s2699_s7 = smov 16  }
 0x297   : > { %2237 = dma.vmem_to_hbm [thread:$0]  (%p3108_p10), %s3042_s6, 2048, %s3040_s13, %s1873_s22, %s2698_s28, %s2698_s28, %s2699_s7  }
 0x298 PF: > { %s1902_s9 = sand.u32 1, %s2676_s18   ;;  %p3109_p1 = scmp.ne.s32.totalorder %s3098_s25, 0 }
 0x299   : > { %p3110_p2 = scmp.ge.s32.totalorder %s2688_s21, 2  ;;  %s1903_s14 = scalar_lea.sflag [#allocation4], %s1902_s9 }
 0x29b   : > { %p2251_p6 = pnand %p3110_p2, %p3109_p1 }
 0x29d   : > { %p2252_p12 = pneg %p2251_p6 }
 0x29f   : > { %2671 = dma.done.wait (%p2252_p12), %s1903_s14, 2048  }
 0x2a0   : > { %2673 = vsyncadd (%p2252_p12), %s1903_s14, 4294965248  ;;  %p19_p7 = scmp.ge.s32.totalorder %s2802_s15, 4   ;;  %s3111_s18 = smov %s2680_s19 }
 0x2a1   : > { %s3112_s19 = smov %s2684_s20  ;;  %s3113_s20 = smov %s2818_s27 }
 0x2a2   : > { %s3114_s21 = smov %s2802_s15  ;;  %21 = sbr.rel (!%p19_p7) target bundleno = 6 (0x6), region = 93 }
 0x2a7   :  { %1908 = vsyncpa [#allocation3], 1 }
 0x2a8   :  { %1910 = vsyncpa [#allocation3 + $0x1], 1 }
 0x2a9   :  { %1911 = vsyncpa [#allocation6], 1 }
 0x2aa   :  { %1912 = vsyncpa [#allocation4], 1 }
 0x2ab   :  { %1914 = vsyncpa [#allocation4 + $0x1], 1 }

</bundles_post_ra>
